<compile_context>
chip_gen: v6e
topology: v6e:2x2x1
jax: 0.10.0
libtpu: 0.0.40
codegen_flags: <defaults>
</compile_context>

<pallas_src>
import jax
import jax.numpy as jnp
from jax import lax
from jax.experimental import pallas as pl
from jax.experimental.pallas import tpu as pltpu


# ----------------------------- Pallas kernel ------------------------------ #

def actor_kernel(s_ref, wall_ref, ball_ref, woutT_ref, boutT_ref, out_ref):
    # s_ref:     [tb, 27]  batch-major spatial tile (f32 or bf16), batch in sublanes
    # wall_ref:  [128, 27] fused branch weights (4 branches x 32-row slabs)
    # ball_ref:  [128, 1]  fused branch biases (zeros for bias-free 'normal' + pad rows)
    # woutT_ref: [9, 32]   final linear weight^T (cols 30,31 are zero pad)
    # boutT_ref: [9, 1]    final linear bias
    # out_ref:   [9, tb]   output^T, batch in lanes (lane-dense stores)
    s = s_ref[...]
    w = wall_ref[...]
    if s.dtype != w.dtype:                      # trace-time guard for mixed-precision callers
        cd = jnp.promote_types(s.dtype, w.dtype)
        s, w = s.astype(cd), w.astype(cd)

    # Q @ K^T-style contraction over the 27 features (lane dim of BOTH operands):
    # the reorientation is done on-chip, keeping the batch in lanes downstream.
    y = lax.dot_general(w, s,
                        dimension_numbers=(((1,), (1,)), ((), ())),
                        preferred_element_type=jnp.float32)          # [128, tb]
    y = y + ball_ref[...]                                            # branch biases (VPU)

    # Sublane slabs at offsets 0/32/64/96 are free re-slices; product on the VPU.
    prod = y[0:32, :] * y[32:64, :] * y[64:96, :] * y[96:128, :]     # [32, tb]

    out = jnp.dot(woutT_ref[...], prod,
                  preferred_element_type=jnp.float32)                # [9, tb]
    out_ref[...] = (out + boutT_ref[...]).astype(out_ref.dtype)


def actor_forward(spatial, car_stats, packed_params, *, tb=None, transpose_output=True):
    """spatial: [B, 3, 9]; car_stats: unused (matches the PyTorch forward).

    packed_params = (wall [128,27], ball [128,1], woutT [9,32], boutT [9,1]).
    Returns [B, 9] (or [9, B] if transpose_output=False).
    """
    del car_stats  # ActorModel.forward never uses car_stats
    wall, ball, woutT, boutT = packed_params
    B = spatial.shape[0]

    # Free, contiguous reshape: no extra XLA pass over the batch before the kernel.
    s = spatial.reshape(B, 27)

    if tb is None:
        # Large lane-dense tiles (amortize ~0.35us/grid-step), capped at 4096,
        # with an even step count when B allows (v7x has 2 TensorCores sharing
        # the "parallel" grid axis).
        if B <= 2 * 128:
            tb = 128
        else:
            n_tiles = max(2, pl.cdiv(B, 4096))
            n_tiles += n_tiles % 2                        # even step count (v7x megacore)
            tb = min(4096, pl.cdiv(pl.cdiv(B, n_tiles), 128) * 128)
    tb = max(128, pl.cdiv(tb, 128) * 128)                 # lane multiple (required)

    grid = (pl.cdiv(B, tb),)                              # ragged last block, no jnp.pad
    flops = 2 * B * (128 * 27 + 9 * 32)
    bytes_accessed = (B * 27 * jnp.dtype(s.dtype).itemsize + B * 9 * 4
                      + 128 * 27 * jnp.dtype(wall.dtype).itemsize
                      + 128 * 4 + 9 * 32 * 4 + 9 * 4)

    outT = pl.pallas_call(
        actor_kernel,
        out_shape=jax.ShapeDtypeStruct((9, B), jnp.float32),
        grid_spec=pltpu.PrefetchScalarGridSpec(
            num_scalar_prefetch=0,
            grid=grid,
            in_specs=[
                pl.BlockSpec((tb, 27), lambda i: (i, 0)),    # spatial tile, batch-major
                pl.BlockSpec((128, 27), lambda i: (0, 0)),   # fused branch weights
                pl.BlockSpec((128, 1), lambda i: (0, 0)),    # fused branch biases
                pl.BlockSpec((9, 32), lambda i: (0, 0)),     # final weight^T
                pl.BlockSpec((9, 1), lambda i: (0, 0)),      # final bias
            ],
            out_specs=pl.BlockSpec((9, tb), lambda i: (0, i)),
        ),
        compiler_params=pltpu.CompilerParams(
            dimension_semantics=("parallel",)),
        cost_estimate=pl.CostEstimate(
            flops=flops, transcendentals=0, bytes_accessed=bytes_accessed),
    )(s, wall, ball, woutT, boutT)

    # Module contract is [B, 9]; consumers that can take [9, B] should pass
    # transpose_output=False and skip this (small) extra pass.
    return outT.T if transpose_output else outT


# -------------------------- Parameter construction ------------------------ #

# branch name, input-slice offset within the 9-dim spatial vector, width, has_bias
_BRANCHES = [("loc", 0, 2, True), ("vel", 2, 2, True),
             ("ang", 4, 2, True), ("nrm", 6, 3, False)]


def init_raw_params(key):
    """Synthetic weights matching the PyTorch module's shapes ((in, out) layout)."""
    keys = jax.random.split(key, 32)
    it = iter(keys)

    def dense(shape, scale=0.3):
        return (scale * jax.random.normal(next(it), shape)).astype(jnp.float32)

    axes = []
    for _ in range(3):  # axes x, y, z (SpatialInput(10) each)
        axes.append(dict(
            loc_w=dense((2, 10)), loc_b=dense((10,), 0.1),
            vel_w=dense((2, 10)), vel_b=dense((10,), 0.1),
            ang_w=dense((2, 10)), ang_b=dense((10,), 0.1),
            nrm_w=dense((3, 10)),
        ))
    wout = dense((30, 9))        # Linear(30, 9) weight, (in, out)
    bout = dense((9,), 0.1)      # Linear(30, 9) bias
    return axes, wout, bout


def pack_params(raw, *, dtype=jnp.bfloat16):
    """Pack raw per-branch weights into the fused kernel layout.

    dtype applies to the fused branch weight matrix (the only sizable operand
    besides the batch); biases / final layer stay float32 (f32 epilogue).
    """
    axes, wout, bout = raw

    # W_all: [27, 128]; rows = spatial feature (axis-major), columns: branch br
    # occupies [br*32, br*32+30), within it axis a -> a*10 .. a*10+9.
    W_all = jnp.zeros((27, 128), jnp.float32)
    b_all = jnp.zeros((128,), jnp.float32)
    for a in range(3):
        p = axes[a]
        for br, (name, off, width, has_bias) in enumerate(_BRANCHES):
            c0 = br * 32 + a * 10
            W_all = W_all.at[a * 9 + off: a * 9 + off + width, c0:c0 + 10].set(
                p[name + "_w"])
            if has_bias:
                b_all = b_all.at[c0:c0 + 10].set(p[name + "_b"])
    wall = W_all.T.astype(dtype)                                      # [128, 27]
    ball = b_all.reshape(128, 1)                                      # [128, 1] f32

    woutT = jnp.zeros((9, 32), jnp.float32).at[:, 0:30].set(wout.T)   # [9, 32]
    boutT = bout.reshape(9, 1)                                        # [9, 1]
    return wall, ball, woutT, boutT


def quantize_branch_weights(raw):
    """bf16-round only the branch weights (exactly what pack_params(dtype=bf16) quantizes)."""
    axes, wout, bout = raw
    q = lambda x: x.astype(jnp.bfloat16).astype(jnp.float32)
    q_axes = [{k: (q(v) if k.endswith("_w") else v) for k, v in p.items()} for p in axes]
    return q_axes, wout, bout


# ------------------------------ JAX reference ------------------------------ #

def actor_reference(spatial, raw):
    """Literal translation of the PyTorch forward (per-axis, per-branch)."""
    axes, wout, bout = raw
    outs = []
    for a in range(3):
        s = spatial[:, a].astype(jnp.float32)   # [B, 9]
        p = axes[a]
        loc = s[:, 0:2] @ p["loc_w"] + p["loc_b"]
        vel = s[:, 2:4] @ p["vel_w"] + p["vel_b"]
        ang = s[:, 4:6] @ p["ang_w"] + p["ang_b"]
        nrm = s[:, 6:9] @ p["nrm_w"]
        outs.append(loc * vel * ang * nrm)
    proc = jnp.concatenate(outs, axis=1)        # [B, 30]
    return proc @ wout + bout                   # [B, 9]


# ----------------------------------- main ---------------------------------- #

if __name__ == "__main__":
    key = jax.random.PRNGKey(0)
    k_param, k_spatial, k_stats = jax.random.split(key, 3)

    raw_params = init_raw_params(k_param)

    B = 500  # not a tile multiple -> exercises the ragged (masked) last block
    spatial = jax.random.normal(k_spatial, (B, 3, 9), dtype=jnp.float32)
    car_stats = jax.random.normal(k_stats, (B, 4), dtype=jnp.float32)  # unused, per module

    # --- float32 path: exact check vs the per-branch reference ---
    out_f32 = actor_forward(spatial, car_stats,
                            pack_params(raw_params, dtype=jnp.float32))
    out_f32 = jax.block_until_ready(out_f32)
    ref_f32 = actor_reference(spatial, raw_params)
    assert out_f32.shape == (B, 9)
    assert jnp.allclose(out_f32, ref_f32, atol=1e-4, rtol=1e-4), "f32 mismatch vs reference"

    # --- bf16 path (recommended for HBM bandwidth; f32 accumulation / epilogue) ---
    spatial_bf16 = spatial.astype(jnp.bfloat16)   # in production the producer emits bf16
    out_bf16 = actor_forward(spatial_bf16, car_stats,
                             pack_params(raw_params, dtype=jnp.bfloat16))
    out_bf16 = jax.block_until_ready(out_bf16)
    ref_q = actor_reference(spatial_bf16.astype(jnp.float32),
                            quantize_branch_weights(raw_params))
    assert out_bf16.shape == (B, 9)
    assert jnp.allclose(out_bf16, ref_q, atol=2e-3, rtol=2e-3), \
        "bf16 mismatch vs quantized reference"

    print("KERNEL_OK")
</pallas_src>

<mosaic_0001>
module attributes {stable_mosaic.version = 11 : i64} {
  func.func @actor_kernel(%arg0: i32, %arg1: memref<256x27xf32, #tpu.memory_space<vmem>>, %arg2: memref<128x27xf32, #tpu.memory_space<vmem>>, %arg3: memref<128x1xf32, #tpu.memory_space<vmem>>, %arg4: memref<9x32xf32, #tpu.memory_space<vmem>>, %arg5: memref<9x1xf32, #tpu.memory_space<vmem>>, %arg6: memref<9x256xf32, #tpu.memory_space<vmem>>) attributes {dimension_semantics = [#tpu.dimension_semantics<parallel>], iteration_bounds = array<i64: 2>, scalar_prefetch = 0 : i64, scratch_operands = 0 : i64, tpu.core_type = #tpu.core_type<tc>, window_params = [{transform_indices = @transform_0, window_bounds = array<i64: 256, 27>}, {pipeline_mode = #tpu.pipeline_mode<synchronous>, transform_indices = @transform_1, window_bounds = array<i64: 128, 27>}, {pipeline_mode = #tpu.pipeline_mode<synchronous>, transform_indices = @transform_2, window_bounds = array<i64: 128, 1>}, {pipeline_mode = #tpu.pipeline_mode<synchronous>, transform_indices = @transform_3, window_bounds = array<i64: 9, 32>}, {pipeline_mode = #tpu.pipeline_mode<synchronous>, transform_indices = @transform_4, window_bounds = array<i64: 9, 1>}, {transform_indices = @transform_5, window_bounds = array<i64: 9, 256>}]} {
    %c0 = arith.constant 0 : index
    %c0_0 = arith.constant 0 : index
    %0 = vector.load %arg1[%c0, %c0_0] : memref<256x27xf32, #tpu.memory_space<vmem>>, vector<256x27xf32>
    %c0_1 = arith.constant 0 : index
    %c0_2 = arith.constant 0 : index
    %1 = vector.load %arg2[%c0_1, %c0_2] : memref<128x27xf32, #tpu.memory_space<vmem>>, vector<128x27xf32>
    %cst = arith.constant dense<0.000000e+00> : vector<128x256xf32>
    %2 = tpu.matmul %1, %0, %cst {dimension_numbers = #tpu.dot_dimension_numbers<[1], [1], [0], [0], [0, 0, 1, 0], [], []>} : vector<128x27xf32>, vector<256x27xf32>, vector<128x256xf32> -> vector<128x256xf32>
    %c0_3 = arith.constant 0 : index
    %c0_4 = arith.constant 0 : index
    %3 = vector.load %arg3[%c0_3, %c0_4] : memref<128x1xf32, #tpu.memory_space<vmem>>, vector<128x1xf32>
    %4 = vector.broadcast %3 : vector<128x1xf32> to vector<128x256xf32>
    %5 = arith.addf %2, %4 : vector<128x256xf32>
    %6 = vector.extract_strided_slice %5 {offsets = [0, 0], sizes = [32, 256], strides = [1, 1]} : vector<128x256xf32> to vector<32x256xf32>
    %7 = vector.extract_strided_slice %5 {offsets = [32, 0], sizes = [32, 256], strides = [1, 1]} : vector<128x256xf32> to vector<32x256xf32>
    %8 = arith.mulf %6, %7 : vector<32x256xf32>
    %9 = vector.extract_strided_slice %5 {offsets = [64, 0], sizes = [32, 256], strides = [1, 1]} : vector<128x256xf32> to vector<32x256xf32>
    %10 = arith.mulf %8, %9 : vector<32x256xf32>
    %11 = vector.extract_strided_slice %5 {offsets = [96, 0], sizes = [32, 256], strides = [1, 1]} : vector<128x256xf32> to vector<32x256xf32>
    %12 = arith.mulf %10, %11 : vector<32x256xf32>
    %c0_5 = arith.constant 0 : index
    %c0_6 = arith.constant 0 : index
    %13 = vector.load %arg4[%c0_5, %c0_6] : memref<9x32xf32, #tpu.memory_space<vmem>>, vector<9x32xf32>
    %cst_7 = arith.constant dense<0.000000e+00> : vector<9x256xf32>
    %14 = tpu.matmul %13, %12, %cst_7 {dimension_numbers = #tpu.dot_dimension_numbers<[1], [0], [0], [1], [0, 0, 1, 1], [], []>} : vector<9x32xf32>, vector<32x256xf32>, vector<9x256xf32> -> vector<9x256xf32>
    %c0_8 = arith.constant 0 : index
    %c0_9 = arith.constant 0 : index
    %15 = vector.load %arg5[%c0_8, %c0_9] : memref<9x1xf32, #tpu.memory_space<vmem>>, vector<9x1xf32>
    %16 = vector.broadcast %15 : vector<9x1xf32> to vector<9x256xf32>
    %17 = arith.addf %14, %16 : vector<9x256xf32>
    %c0_10 = arith.constant 0 : index
    %c0_11 = arith.constant 0 : index
    %18 = vector.load %arg6[%c0_10, %c0_11] : memref<9x256xf32, #tpu.memory_space<vmem>>, vector<9x256xf32>
    tpu.vector_store %arg6[%c0_10, %c0_11], %17 {strides = array<i32>} : memref<9x256xf32, #tpu.memory_space<vmem>>, vector<9x256xf32>,
    return
  }
  func.func @transform_0(%arg0: i32) -> (i32, i32) {
    %c0_i32 = arith.constant 0 : i32
    %c0_i32_0 = arith.constant 0 : i32
    return %arg0, %c0_i32 : i32, i32
  }
  func.func @transform_1(%arg0: i32) -> (i32, i32) {
    %c0_i32 = arith.constant 0 : i32
    %c0_i32_0 = arith.constant 0 : i32
    %c0_i32_1 = arith.constant 0 : i32
    return %c0_i32, %c0_i32_0 : i32, i32
  }
  func.func @transform_2(%arg0: i32) -> (i32, i32) {
    %c0_i32 = arith.constant 0 : i32
    %c0_i32_0 = arith.constant 0 : i32
    %c0_i32_1 = arith.constant 0 : i32
    return %c0_i32, %c0_i32_0 : i32, i32
  }
  func.func @transform_3(%arg0: i32) -> (i32, i32) {
    %c0_i32 = arith.constant 0 : i32
    %c0_i32_0 = arith.constant 0 : i32
    %c0_i32_1 = arith.constant 0 : i32
    return %c0_i32, %c0_i32_0 : i32, i32
  }
  func.func @transform_4(%arg0: i32) -> (i32, i32) {
    %c0_i32 = arith.constant 0 : i32
    %c0_i32_0 = arith.constant 0 : i32
    %c0_i32_1 = arith.constant 0 : i32
    return %c0_i32, %c0_i32_0 : i32, i32
  }
  func.func @transform_5(%arg0: i32) -> (i32, i32) {
    %c0_i32 = arith.constant 0 : i32
    %c0_i32_0 = arith.constant 0 : i32
    return %c0_i32, %arg0 : i32, i32
  }
}

</mosaic_0001>

<bundles_post_ra>
// kernel: tpu_custom_call.1
= control target key start
LH: loop header
LB: loop body
LE: loop exit
PB: predicated region body
PF: predicated region fallthrough
CT: control target
= control target key end

     0   :  { %10 = vsyncpa [#allocation3], 0  ;;  %s1565_s0 = inlined_call_operand.vmem [shape: f32[500,27], index: 0, kind: input, shape index: {}]   ;;  %s1566_s1 = inlined_call_operand.vmem [shape: f32[128,27], index: 1, kind: input, shape index: {}]   ;;  %s1567_s2 = inlined_call_operand.vmem [shape: f32[128,1], index: 2, kind: input, shape index: {}]   ;;  %s1568_s3 = inlined_call_operand.vmem [shape: f32[9,32], index: 3, kind: input, shape index: {}]   ;;  %s1569_s4 = inlined_call_operand.vmem [shape: f32[9,1], index: 4, kind: input, shape index: {}]   ;;  %s1570_s5 = inlined_call_operand.hbm [shape: f32[9,500], index: 5, kind: output, shape index: {}]  }
   0x1   :  { %12 = vsyncpa [#allocation3 + $0x1], 0  ;;  %s1201_s18 = smov 0   ;;  %s1203_s19 = smov 0  }
   0x2   :  { %s1205_s20 = smov 0   ;;  %s1207_s21 = smov 0  }
   0x3 LB: > { %s1222_s22 = sadd.s32 4294967295, %s1163_s21   ;;  %s898_s23 = sadd.s32 4294967294, %s1163_s21   ;;  %s1163_s21 = sphi %s1207_s21, %s1576_s21   ;;  %s1159_s20 = sphi %s1205_s20, %s1575_s20   ;;  %s1155_s19 = sphi %s1203_s19, %s1574_s19   ;;  %s1151_s18 = sphi %s1201_s18, %s1573_s18  }
   0x4   : > { %s1226_s24 = sadd.s32 1, %s1163_s21   ;;  %s135_s25 = sadd.s32 1, %s1159_s20 }
   0x5   : > { %s132_s26 = ssub.s32 %s1163_s21, %s1226_s24  ;;  %p145_p0 = scmp.ne.s32.totalorder %s1159_s20, %s1155_s19 }
   0x6   : > { %p133_p1 = scmp.eq.s32.totalorder %s132_s26, 0  ;;  %p146_p2 = scmp.eq.s32.totalorder %s1222_s22, 1 }
   0x7   : > { %p151_p3 = scmp.ne.s32.totalorder %s1155_s19, %s1151_s18  ;;  %p152_p4 = scmp.eq.s32.totalorder %s898_s23, 1 }
   0x8   : > { %s1237_s27 = scalar_select %p133_p1, %s1159_s20, %s135_s25  }
   0x9   : > { %p1239_p5 = por %p146_p2, %p145_p0  ;;  %p1243_p6 = por %p152_p4, %p151_p3 }
   0xa   : > { %p901_p7 = scmp.ge.s32.totalorder %s1163_s21, 1  ;;  %p199_p8 = scmp.lt.s32.totalorder %s1163_s21, 3 }
   0xc   : > { %p200_p9 = pnand %p901_p7, %p199_p8 }
   0xd   : > { %s903_s30 = sshll.u32 (!%p200_p9), %s1222_s22, 5  ;;  %s228_s26 = sand.u32 (!%p200_p9), 1, %s1155_s19  }
   0xe   : > { %203 = sbr.rel (%p200_p9) target bundleno = 542 (0x21e), region = 40  ;;  %p236_p10 = scmp.lt.s32.totalorder (!%p200_p9), %s903_s30, 62 }
   0xf   : > { %s1525_s11 = scalar_lea.sflag (!%p200_p9), [#allocation3], %s228_s26  ;;  %s1167_s12 = smov (!%p200_p9), [#allocation2]  }
  0x10   : > { %s1107_s13 = sshll.u32 (!%p200_p9), %s1167_s12, 4  ;;  %s1108_s13 = int_to_ptr.vmem [resolvable:$false] %s1107_s13 }
  0x11   : > { %s1109_s14 = scalar_lea.vmem (!%p200_p9), %s1108_s13, 1024 }
  0x13   : > { %vm390_vm0 = vcmask 220160   ;;  %v1253_v0 = vld [vmem:[%s1566_s1] sm:$0xff]  ;;  %v1258_v1 = vld [vmem:[%s1566_s1 + $0x48] sm:$0xff]  ;;  %v1165_v2 = vmov 0   ;;  %s1578_s30 = smov (!%p236_p10, %s903_s30), 62  ;;  %v296_v3 = vld [vmem:[%s1567_s2 + $0x10] sm:$0xff] }
  0x14   : > { %993 = vmatprep.mubr.msk.f32.mxu0 %vm390_vm0, %v1253_v0  ;;  %1011 = vmatprep.mubr.msk.f32.mxu1 %vm390_vm0, %v1258_v1  ;;  %s904_s10 = sshll.u32 %s1578_s30, 3  ;;  %v297_v4 = vld [vmem:[%s1567_s2 + $0x18] sm:$0xff]  ;;  %v300_v8 = vld [vmem:[%s1567_s2 + $0x30] sm:$0xff]  ;;  %v295_v12 = vld [vmem:[%s1567_s2 + $0x8] sm:$0xff]  ;;  %vm734_vm1 = vcmask 261120   ;;  %s902_s30 = sshll.u32 %s228_s26, 5 }
  0x15   : > { %1102 = vset.pattern.permute.xlu1 %v1165_v2  ;;  %1101 = vset.pattern.permute.xlu0 %v1165_v2  ;;  %s1273_s17 = scalar_lea.vmem %s1565_s0, %s904_s10  ;;  %v301_v9 = vld [vmem:[%s1567_s2 + $0x38] sm:$0xff]  ;;  %v304_v17 = vld [vmem:[%s1567_s2 + $0x50] sm:$0xff]  ;;  %v299_v19 = vld [vmem:[%s1567_s2 + $0x28] sm:$0xff]  ;;  %s230_s6 = scalar_lea.vmem [#allocation2], %s902_s30 }
  0x16   : > { %322 = vperm.xlu1 %1102, %v296_v3   ;;  %327 = vperm.xlu0 %1101, %v297_v4   ;;  %v277_v5 = vld [vmem:[%s1273_s17 + $0xf8] sm:$0xff]  ;;  %v276_v7 = vld [vmem:[%s1273_s17 + $0xf0] sm:$0xff]  ;;  %v275_v11 = vld [vmem:[%s1273_s17 + $0xe8] sm:$0xff]  ;;  %v1166_v3 = vmov 0.0   ;;  %s836_s7 = sshll.u32 %s230_s6, 4  ;;  %s1518_s7 = int_to_ptr.vmem [resolvable:$true] %s836_s7 }
  0x17   : > { %v261_v6 = vld [vmem:[%s1273_s17 + $0x78] sm:$0xff]  ;;  %961 = vmatprep.subr.msk.mxu0 %vm390_vm0, %v277_v5  ;;  %1025 = vmatprep.subr.msk.mxu1 %vm390_vm0, %v277_v5  ;;  %v260_v10 = vld [vmem:[%s1273_s17 + $0x70] sm:$0xff]  ;;  %v259_v13 = vld [vmem:[%s1273_s17 + $0x68] sm:$0xff]  ;;  %p1110_p0 = scmp.lt.s32.totalorder %s1518_s7, %s1108_s13 }
  0x18   : > { %962 = vmatpush3.xpose.msk.msra.mxu0 %vm390_vm0, %v261_v6  ;;  %1041 = vmatpush3.xpose.msk.msra.mxu1 %vm390_vm0, %v261_v6  ;;  %v274_v14 = vld [vmem:[%s1273_s17 + $0xe0] sm:$0xff]  ;;  %v305_v15 = vld [vmem:[%s1567_s2 + $0x58] sm:$0xff]  ;;  %v272_v22 = vld [vmem:[%s1273_s17 + $0xd0] sm:$0xff] }
  0x19   : > { %963 = vmatprep.subr.msk.mxu0 %vm390_vm0, %v276_v7  ;;  %1026 = vmatprep.subr.msk.mxu1 %vm390_vm0, %v276_v7  ;;  %v258_v16 = vld [vmem:[%s1273_s17 + $0x60] sm:$0xff]  ;;  %v273_v18 = vld [vmem:[%s1273_s17 + $0xd8] sm:$0xff]  ;;  %v303_v24 = vld [vmem:[%s1567_s2 + $0x48] sm:$0xff] }
  0x1a   : > { %342 = vperm.xlu1 %1102, %v300_v8   ;;  %347 = vperm.xlu0 %1101, %v301_v9   ;;  %v294_v20 = vld [vmem:[%s1567_s2] sm:$0xff]  ;;  %v257_v21 = vld [vmem:[%s1273_s17 + $0x58] sm:$0xff]  ;;  %v256_v25 = vld [vmem:[%s1273_s17 + $0x50] sm:$0xff] }
  0x1b   : > { %v309_v23 = vld [vmem:[%s1567_s2 + $0x78] sm:$0xff]  ;;  %v271_v26 = vld [vmem:[%s1273_s17 + $0xc8] sm:$0xff]  ;;  %v298_v27 = vld [vmem:[%s1567_s2 + $0x20] sm:$0xff] }
  0x1c   : > { %964 = vmatpush3.xpose.msk.msra.mxu0 %vm390_vm0, %v260_v10  ;;  %1042 = vmatpush3.xpose.msk.msra.mxu1 %vm390_vm0, %v260_v10  ;;  %v302_v28 = vld [vmem:[%s1567_s2 + $0x40] sm:$0xff]  ;;  %v255_v29 = vld [vmem:[%s1273_s17 + $0x48] sm:$0xff]  ;;  %v308_v31 = vld [vmem:[%s1567_s2 + $0x70] sm:$0xff] }
  0x1d   : > { %965 = vmatprep.subr.msk.mxu0 %vm390_vm0, %v275_v11  ;;  %1027 = vmatprep.subr.msk.mxu1 %vm390_vm0, %v275_v11  ;;  %v270_v30 = vld [vmem:[%s1273_s17 + $0xc0] sm:$0xff]  ;;  %v269_v34 = vld [vmem:[%s1273_s17 + $0xb8] sm:$0xff]  ;;  %v307_v35 = vld [vmem:[%s1567_s2 + $0x68] sm:$0xff] }
  0x1e   : > { %317 = vperm.xlu1 %1102, %v295_v12   ;;  %367 = vperm.xlu0 %1101, %v305_v15   ;;  %v306_v32 = vld [vmem:[%s1567_s2 + $0x60] sm:$0xff]  ;;  %v723_v36 = vld [vmem:[%s1569_s4 + $0x8] sm:$0x1]  ;;  %v253_v37 = vld [vmem:[%s1273_s17 + $0x38] sm:$0xff] }
  0x1f   : > { %v254_v33 = vld [vmem:[%s1273_s17 + $0x40] sm:$0xff]  ;;  %v268_v38 = vld [vmem:[%s1273_s17 + $0xb0] sm:$0xff]  ;;  %v267_v41 = vld [vmem:[%s1273_s17 + $0xa8] sm:$0xff] }
  0x20   : > { %966 = vmatpush3.xpose.msk.msra.mxu0 %vm390_vm0, %v259_v13  ;;  %1043 = vmatpush3.xpose.msk.msra.mxu1 %vm390_vm0, %v259_v13  ;;  %v722_v39 = vld [vmem:[%s1569_s4] sm:$0xff]  ;;  %v252_v40 = vld [vmem:[%s1273_s17 + $0x30] sm:$0xff]  ;;  %v251_v42 = vld [vmem:[%s1273_s17 + $0x28] sm:$0xff] }
  0x21   : > { %967 = vmatprep.subr.msk.mxu0 %vm390_vm0, %v274_v14  ;;  %1028 = vmatprep.subr.msk.mxu1 %vm390_vm0, %v274_v14  ;;  %v266_v43 = vld [vmem:[%s1273_s17 + $0xa0] sm:$0xff]  ;;  %v265_v45 = vld [vmem:[%s1273_s17 + $0x98] sm:$0xff]  ;;  %v264_v47 = vld [vmem:[%s1273_s17 + $0x90] sm:$0xff] }
  0x22   : > { %362 = vperm.xlu1 %1102, %v304_v17   ;;  %337 = vperm.xlu0 %1101, %v299_v19   ;;  %v250_v44 = vld [vmem:[%s1273_s17 + $0x20] sm:$0xff]  ;;  %v249_v46 = vld [vmem:[%s1273_s17 + $0x18] sm:$0xff]  ;;  %v248_v48 = vld [vmem:[%s1273_s17 + $0x10] sm:$0xff] }
  0x23   : > { %v263_v49 = vld [vmem:[%s1273_s17 + $0x88] sm:$0xff]  ;;  %v262_v51 = vld [vmem:[%s1273_s17 + $0x80] sm:$0xff]  ;;  %v288_v54 = vld [vmem:[%s1566_s1 + $0x50] sm:$0xff] }
  0x24   : > { %968 = vmatpush3.xpose.msk.msra.mxu0 %vm390_vm0, %v258_v16  ;;  %1044 = vmatpush3.xpose.msk.msra.mxu1 %vm390_vm0, %v258_v16  ;;  %v247_v50 = vld [vmem:[%s1273_s17 + $0x8] sm:$0xff]  ;;  %v246_v52 = vld [vmem:[%s1273_s17] sm:$0xff]  ;;  %v280_v55 = vld [vmem:[%s1566_s1 + $0x10] sm:$0xff]  ;;  %s960_s17 = sshll.u32 %s1222_s22, 8  ;;  %s1103_s22 = scalar_lea.vmem %s1518_s7, 512 }
  0x25   : > { %969 = vmatprep.subr.msk.mxu0 %vm390_vm0, %v273_v18  ;;  %1029 = vmatprep.subr.msk.mxu1 %vm390_vm0, %v273_v18  ;;  %v279_v53 = vld [vmem:[%s1566_s1 + $0x8] sm:$0xff]  ;;  %v289_v56 = vld [vmem:[%s1566_s1 + $0x58] sm:$0xff]  ;;  %v290_v58 = vld [vmem:[%s1566_s1 + $0x60] sm:$0xff]  ;;  %s1523_s10 = scalar_lea.hbm %s1570_s5, %s960_s17  ;;  %p1104_p11 = scmp.ne.s32.totalorder %s1518_s7, %s1103_s22 }
  0x26   : > { %312 = vperm.xlu1 %1102, %v294_v20   ;;  %387 = vperm.xlu0 %1101, %v309_v23   ;;  %v281_v57 = vld [vmem:[%s1566_s1 + $0x18] sm:$0xff]  ;;  %v282_v59 = vld [vmem:[%s1566_s1 + $0x20] sm:$0xff]  ;;  %v291_v60 = vld [vmem:[%s1566_s1 + $0x68] sm:$0xff]  ;;  %p1111_p1 = scmp.lt.s32.totalorder %s1109_s14, %s1103_s22 }
  0x27   : > { %v283_v61 = vld [vmem:[%s1566_s1 + $0x28] sm:$0xff]  ;;  %v292_v62 = vld [vmem:[%s1566_s1 + $0x70] sm:$0xff]  ;;  %v286_v2 = vld [vmem:[%s1566_s1 + $0x40] sm:$0xff]  ;;  %p1105_p12 = pnand %p1104_p11, %p1239_p5 }
  0x28   : > { %970 = vmatpush3.xpose.msk.msra.mxu0 %vm390_vm0, %v257_v21  ;;  %1045 = vmatpush3.xpose.msk.msra.mxu1 %vm390_vm0, %v257_v21  ;;  %v284_v63 = vld [vmem:[%s1566_s1 + $0x30] sm:$0xff]  ;;  %p1112_p2 = por %p1111_p1, %p1110_p0 }
  0x29   : > { %971 = vmatprep.subr.msk.mxu0 %vm390_vm0, %v272_v22  ;;  %1030 = vmatprep.subr.msk.mxu1 %vm390_vm0, %v272_v22  ;;  %p1106_p13 = pneg %p1105_p12 }
  0x2a   : > { %357 = vperm.xlu1 %1102, %v303_v24   ;;  %332 = vperm.xlu0 %1101, %v298_v27  }
  0x2b   : > { %p1113_p3 = pnand %p1112_p2, %p1106_p13 }
  0x2c   : > { %972 = vmatpush3.xpose.msk.msra.mxu0 %vm390_vm0, %v256_v25  ;;  %1046 = vmatpush3.xpose.msk.msra.mxu1 %vm390_vm0, %v256_v25 }
  0x2d   : > { %973 = vmatprep.subr.msk.mxu0 %vm390_vm0, %v271_v26  ;;  %1031 = vmatprep.subr.msk.mxu1 %vm390_vm0, %v271_v26 }
  0x2e   : > { %352 = vperm.xlu1 %1102, %v302_v28   ;;  %382 = vperm.xlu0 %1101, %v308_v31  }
  0x30   : > { %974 = vmatpush3.xpose.msk.msra.mxu0 %vm390_vm0, %v255_v29  ;;  %1047 = vmatpush3.xpose.msk.msra.mxu1 %vm390_vm0, %v255_v29 }
  0x31   : > { %975 = vmatprep.subr.msk.mxu0 %vm390_vm0, %v270_v30  ;;  %1032 = vmatprep.subr.msk.mxu1 %vm390_vm0, %v270_v30 }
  0x32   : > { %372 = vperm.xlu1 %1102, %v306_v32   ;;  %377 = vperm.xlu0 %1101, %v307_v35  }
  0x34   : > { %976 = vmatpush3.xpose.msk.msra.mxu0 %vm390_vm0, %v254_v33  ;;  %1048 = vmatpush3.xpose.msk.msra.mxu1 %vm390_vm0, %v254_v33 }
  0x35   : > { %977 = vmatprep.subr.msk.mxu0 %vm390_vm0, %v269_v34  ;;  %1033 = vmatprep.subr.msk.mxu1 %vm390_vm0, %v269_v34 }
  0x36   : > { %731 = vperm.xlu1 %1102, %v723_v36   ;;  %726 = vperm.xlu0 %1101, %v722_v39  }
  0x38   : > { %978 = vmatpush3.xpose.msk.msra.mxu0 %vm390_vm0, %v253_v37  ;;  %1049 = vmatpush3.xpose.msk.msra.mxu1 %vm390_vm0, %v253_v37 }
  0x39   : > { %979 = vmatprep.subr.msk.mxu0 %vm390_vm0, %v268_v38  ;;  %1034 = vmatprep.subr.msk.mxu1 %vm390_vm0, %v268_v38 }
  0x3c   : > { %980 = vmatpush3.xpose.msk.msra.mxu0 %vm390_vm0, %v252_v40  ;;  %1050 = vmatpush3.xpose.msk.msra.mxu1 %vm390_vm0, %v252_v40 }
  0x3d   : > { %981 = vmatprep.subr.msk.mxu0 %vm390_vm0, %v267_v41  ;;  %1035 = vmatprep.subr.msk.mxu1 %vm390_vm0, %v267_v41 }
  0x40   : > { %982 = vmatpush3.xpose.msk.msra.mxu0 %vm390_vm0, %v251_v42  ;;  %1051 = vmatpush3.xpose.msk.msra.mxu1 %vm390_vm0, %v251_v42 }
  0x41   : > { %983 = vmatprep.subr.msk.mxu0 %vm390_vm0, %v266_v43  ;;  %1036 = vmatprep.subr.msk.mxu1 %vm390_vm0, %v266_v43 }
  0x44   : > { %984 = vmatpush3.xpose.msk.msra.mxu0 %vm390_vm0, %v250_v44  ;;  %1052 = vmatpush3.xpose.msk.msra.mxu1 %vm390_vm0, %v250_v44 }
  0x45   : > { %985 = vmatprep.subr.msk.mxu0 %vm390_vm0, %v265_v45  ;;  %1037 = vmatprep.subr.msk.mxu1 %vm390_vm0, %v265_v45 }
  0x48   : > { %986 = vmatpush3.xpose.msk.msra.mxu0 %vm390_vm0, %v249_v46  ;;  %1053 = vmatpush3.xpose.msk.msra.mxu1 %vm390_vm0, %v249_v46 }
  0x49   : > { %987 = vmatprep.subr.msk.mxu0 %vm390_vm0, %v264_v47  ;;  %1038 = vmatprep.subr.msk.mxu1 %vm390_vm0, %v264_v47 }
  0x4c   : > { %988 = vmatpush3.xpose.msk.msra.mxu0 %vm390_vm0, %v248_v48  ;;  %1054 = vmatpush3.xpose.msk.msra.mxu1 %vm390_vm0, %v248_v48 }
  0x4d   : > { %989 = vmatprep.subr.msk.mxu0 %vm390_vm0, %v263_v49  ;;  %1039 = vmatprep.subr.msk.mxu1 %vm390_vm0, %v263_v49 }
  0x50   : > { %990 = vmatpush3.xpose.msk.msra.mxu0 %vm390_vm0, %v247_v50  ;;  %1055 = vmatpush3.xpose.msk.msra.mxu1 %vm390_vm0, %v247_v50 }
  0x51   : > { %991 = vmatprep.subr.msk.mxu0 %vm390_vm0, %v262_v51  ;;  %1040 = vmatprep.subr.msk.mxu1 %vm390_vm0, %v262_v51 }
  0x54   : > { %992 = vmatpush3.xpose.msk.msra.mxu0 %vm390_vm0, %v246_v52  ;;  %1056 = vmatpush3.xpose.msk.msra.mxu1 %vm390_vm0, %v246_v52 }
  0x57   : > { %994 = vmatmul.mubr.msk.f32.vlgmr.msra.gmra.mxu0 %vm390_vm0, %v1253_v0  ;;  %1012 = vmatmul.mubr.msk.f32.vlgmr.msra.gmra.mxu1 %vm390_vm0, %v1258_v1  ;;  %v293_v0 = vld [vmem:[%s1566_s1 + $0x78] sm:$0xff] }
  0x58   : > { %995 = vmatprep.mubr.msk.f32.mxu0 %vm390_vm0, %v279_v53  ;;  %1013 = vmatprep.mubr.msk.f32.mxu1 %vm390_vm0, %v288_v54  ;;  %v285_v1 = vld [vmem:[%s1566_s1 + $0x38] sm:$0xff] }
  0x5b   : > { %996 = vmatmul.mubr.msk.f32.gmra.mxu0 %vm390_vm0, %v279_v53  ;;  %1014 = vmatmul.mubr.msk.f32.gmra.mxu1 %vm390_vm0, %v288_v54 }
  0x5c   : > { %997 = vmatprep.mubr.msk.f32.mxu0 %vm390_vm0, %v280_v55  ;;  %1015 = vmatprep.mubr.msk.f32.mxu1 %vm390_vm0, %v289_v56 }
  0x5f   : > { %998 = vmatmul.mubr.msk.f32.gmra.mxu0 %vm390_vm0, %v280_v55  ;;  %1016 = vmatmul.mubr.msk.f32.gmra.mxu1 %vm390_vm0, %v289_v56 }
  0x60   : > { %999 = vmatprep.mubr.msk.f32.mxu0 %vm390_vm0, %v281_v57  ;;  %1017 = vmatprep.mubr.msk.f32.mxu1 %vm390_vm0, %v290_v58 }
  0x63   : > { %1000 = vmatmul.mubr.msk.f32.gmra.mxu0 %vm390_vm0, %v281_v57  ;;  %1018 = vmatmul.mubr.msk.f32.gmra.mxu1 %vm390_vm0, %v290_v58 }
  0x64   : > { %1001 = vmatprep.mubr.msk.f32.mxu0 %vm390_vm0, %v282_v59  ;;  %1019 = vmatprep.mubr.msk.f32.mxu1 %vm390_vm0, %v291_v60 }
  0x67   : > { %1002 = vmatmul.mubr.msk.f32.gmra.mxu0 %vm390_vm0, %v282_v59  ;;  %1020 = vmatmul.mubr.msk.f32.gmra.mxu1 %vm390_vm0, %v291_v60 }
  0x68   : > { %1003 = vmatprep.mubr.msk.f32.mxu0 %vm390_vm0, %v283_v61  ;;  %1021 = vmatprep.mubr.msk.f32.mxu1 %vm390_vm0, %v292_v62 }
  0x6b   : > { %1004 = vmatmul.mubr.msk.f32.gmra.mxu0 %vm390_vm0, %v283_v61  ;;  %1022 = vmatmul.mubr.msk.f32.gmra.mxu1 %vm390_vm0, %v292_v62 }
  0x6c   : > { %1005 = vmatprep.mubr.msk.f32.mxu0 %vm390_vm0, %v284_v63  ;;  %1023 = vmatprep.mubr.msk.f32.mxu1 %vm390_vm0, %v293_v0 }
  0x6f   : > { %1006 = vmatmul.mubr.msk.f32.gmra.mxu0 %vm390_vm0, %v284_v63  ;;  %1024 = vmatmul.mubr.msk.f32.gmra.mxu1 %vm390_vm0, %v293_v0 }
  0x70   : > { %1007 = vmatprep.mubr.msk.f32.mxu0 %vm390_vm0, %v285_v1  ;;  %805 = vmatprep.mubr.f32.mxu1 %v1166_v3 }
  0x73   : > { %1008 = vmatmul.mubr.msk.f32.gmra.mxu0 %vm390_vm0, %v285_v1 }
  0x74   : > { %1009 = vmatprep.mubr.msk.f32.mxu0 %vm390_vm0, %v286_v2 }
  0x77   : > { %1010 = vmatmul.mubr.msk.f32.gmra.mxu0 %vm390_vm0, %v286_v2 }
  0x91   : > { %v328_v4 = vpop.permute.xlu0 %327  ;;  %v323_v5 = vpop.permute.xlu1 %322 }
  0x95   : > { %v348_v8 = vpop.permute.xlu0 %347  ;;  %v343_v11 = vpop.permute.xlu1 %342 }
  0x99   : > { %v368_v16 = vpop.permute.xlu0 %367  ;;  %v318_v19 = vpop.permute.xlu1 %317 }
  0x9d   : > { %v338_v24 = vpop.permute.xlu0 %337  ;;  %v363_v27 = vpop.permute.xlu1 %362 }
  0xa1   : > { %v388_v32 = vpop.permute.xlu0 %387  ;;  %v313_v35 = vpop.permute.xlu1 %312 }
  0xa5   : > { %v333_v39 = vpop.permute.xlu0 %332  ;;  %v358_v41 = vpop.permute.xlu1 %357 }
  0xa9   : > { %v383_v57 = vpop.permute.xlu0 %382 }
 0x117   : > { %v601_v6 = vpop.f32.mrf.mxu0  ;;  %v1494_v7 = vpop.f32.mrf.mxu1 }
 0x118   : > { %v602_v43 = vadd.f32 %v601_v6, %v313_v35 }
 0x119   : > { %v603_v9 = vpop.f32.mrf.mxu0  ;;  %v657_v10 = vpop.f32.mrf.mxu1 }
 0x11a   : > { %v604_v44 = vadd.f32 %v603_v9, %v313_v35  ;;  %v658_v53 = vadd.f32 %v657_v10, %v358_v41  ;;  %v353_v10 = vpop.permute.xlu1 %352 }
 0x11b   : > { %v607_v12 = vpop.f32.mrf.mxu0  ;;  %v661_v13 = vpop.f32.mrf.mxu1 }
 0x11c   : > { %v608_v62 = vadd.f32 %v607_v12, %v318_v19  ;;  %v656_v12 = vadd.f32 %v1494_v7, %v358_v41 }
 0x11d   : > { %v609_v14 = vpop.f32.mrf.mxu0  ;;  %v663_v15 = vpop.f32.mrf.mxu1 }
 0x11e   : > { %v610_v52 = vadd.f32 %v609_v14, %v318_v19  ;;  %v664_v63 = vadd.f32 %v663_v15, %v363_v27  ;;  %v662_v14 = vadd.f32 %v661_v13, %v363_v27  ;;  %v373_v7 = vpop.permute.xlu1 %372 }
 0x11f   : > { %v613_v17 = vpop.f32.mrf.mxu0  ;;  %v667_v18 = vpop.f32.mrf.mxu1 }
 0x120   : > { %v614_v54 = vadd.f32 %v613_v17, %v323_v5  ;;  %v668_v0 = vadd.f32 %v667_v18, %v368_v16 }
 0x121   : > { %v615_v20 = vpop.f32.mrf.mxu0  ;;  %v669_v21 = vpop.f32.mrf.mxu1 }
 0x122   : > { %v616_v48 = vadd.f32 %v615_v20, %v323_v5  ;;  %v670_v9 = vadd.f32 %v669_v21, %v368_v16 }
 0x123   : > { %v619_v22 = vpop.f32.mrf.mxu0  ;;  %v1496_v23 = vpop.f32.mrf.mxu1 }
 0x124   : > { %v620_v49 = vadd.f32 %v619_v22, %v328_v4 }
 0x125   : > { %v621_v25 = vpop.f32.mrf.mxu0  ;;  %v1498_v26 = vpop.f32.mrf.mxu1 }
 0x126   : > { %v622_v58 = vadd.f32 %v621_v25, %v328_v4 }
 0x127   : > { %v625_v28 = vpop.f32.mrf.mxu0  ;;  %v1500_v29 = vpop.f32.mrf.mxu1 }
 0x128   : > { %v626_v5 = vadd.f32 %v625_v28, %v333_v39 }
 0x129   : > { %v627_v30 = vpop.f32.mrf.mxu0  ;;  %v1502_v31 = vpop.f32.mrf.mxu1 }
 0x12a   : > { %v696_v13 = vmul.f32 %v626_v5, %v602_v43  ;;  %v674_v43 = vadd.f32 %v1496_v23, %v373_v7  ;;  %v721_v23 = vld [vmem:[%s1568_s3 + $0x8] sm:$0x1] }
 0x12b   : > { %v631_v33 = vpop.f32.mrf.mxu0  ;;  %v685_v34 = vpop.f32.mrf.mxu1 }
 0x12c   : > { %v632_v55 = vadd.f32 %v631_v33, %v338_v24  ;;  %v686_v28 = vadd.f32 %v685_v34, %v383_v57 }
 0x12d   : > { %v633_v36 = vpop.f32.mrf.mxu0  ;;  %v687_v37 = vpop.f32.mrf.mxu1 }
 0x12e   : > { %v634_v50 = vadd.f32 %v633_v36, %v338_v24  ;;  %v698_v17 = vmul.f32 %v632_v55, %v608_v62  ;;  %v688_v21 = vadd.f32 %v687_v37, %v383_v57 }
 0x12f   : > { %v637_v38 = vpop.f32.mrf.mxu0  ;;  %v691_v46 = vpop.f32.mrf.mxu1 }
 0x130   : > { %v638_v45 = vadd.f32 %v637_v38, %v343_v11  ;;  %v699_v20 = vmul.f32 %v634_v50, %v610_v52  ;;  %v692_v18 = vadd.f32 %v691_v46, %v388_v32  ;;  %v378_v38 = vpop.permute.xlu0 %377  ;;  %v706_v27 = vmul.f32 %v698_v17, %v656_v12  ;;  %v732_v52 = vpop.permute.xlu1 %731 }
 0x131   : > { %v639_v40 = vpop.f32.mrf.mxu0  ;;  %v693_v2 = vpop.f32.mrf.mxu1 }
 0x132   : > { %v640_v42 = vadd.f32 %v639_v40, %v343_v11  ;;  %v700_v1 = vmul.f32 %v638_v45, %v614_v54  ;;  %v628_v11 = vadd.f32 %v627_v30, %v333_v39  ;;  %v694_v25 = vadd.f32 %v693_v2, %v388_v32 }
 0x133   : > { %v643_v47 = vpop.f32.mrf.mxu0  ;;  %v707_v16 = vmul.f32 %v699_v20, %v658_v53  ;;  %v682_v40 = vadd.f32 %v1502_v31, %v378_v38 }
 0x134   : > { %v644_v51 = vadd.f32 %v643_v47, %v348_v8  ;;  %v701_v59 = vmul.f32 %v640_v42, %v616_v48  ;;  %v708_v15 = vmul.f32 %v700_v1, %v662_v14  ;;  %v697_v36 = vmul.f32 %v628_v11, %v604_v44 }
 0x135   : > { %v645_v56 = vpop.f32.mrf.mxu0  ;;  %v680_v47 = vadd.f32 %v1500_v29, %v378_v38  ;;  %v676_v44 = vadd.f32 %v1498_v26, %v373_v7  ;;  %v715_v37 = vmul.f32 %v707_v16, %v682_v40  ;;  %v720_v29 = vld [vmem:[%s1568_s3] sm:$0xff]  ;;  %v727_v26 = vpop.permute.xlu0 %726 }
 0x136   : > { %v702_v60 = vmul.f32 %v644_v51, %v620_v49  ;;  %v646_v61 = vadd.f32 %v645_v56, %v348_v8  ;;  %v709_v4 = vmul.f32 %v701_v59, %v664_v63  ;;  %v716_v41 = vmul.f32 %v708_v15, %v686_v28 }
 0x137   : > { %v649_v6 = vpop.f32.mrf.mxu0  ;;  %v714_v34 = vmul.f32 %v706_v27, %v680_v47 }
 0x138   : > { %v703_v22 = vmul.f32 %v646_v61, %v622_v58  ;;  %v710_v24 = vmul.f32 %v702_v60, %v668_v0  ;;  %v650_v19 = vadd.f32 %v649_v6, %v353_v10  ;;  %v717_v45 = vmul.f32 %v709_v4, %v688_v21 }
 0x139   : > { %v651_v33 = vpop.f32.mrf.mxu0 }
 0x13a   : > { %v711_v35 = vmul.f32 %v703_v22, %v670_v9  ;;  %v652_v8 = vadd.f32 %v651_v33, %v353_v10  ;;  %v718_v39 = vmul.f32 %v710_v24, %v692_v18  ;;  %v704_v32 = vmul.f32 %v696_v13, %v650_v19 }
 0x13c   : > { %v719_v30 = vmul.f32 %v711_v35, %v694_v25  ;;  %v705_v42 = vmul.f32 %v697_v36, %v652_v8  ;;  %v712_v46 = vmul.f32 %v704_v32, %v674_v43 }
 0x13e   : > { %765 = vmatprep.subr.mxu1 %v719_v30  ;;  %v713_v31 = vmul.f32 %v705_v42, %v676_v44 }
 0x13f   : > { %766 = vmatpush1.msra.mxu1 %v718_v39 }
 0x140   : > { %767 = vmatprep.subr.mxu1 %v717_v45 }
 0x141   : > { %768 = vmatpush1.msra.mxu1 %v716_v41 }
 0x142   : > { %769 = vmatprep.subr.mxu1 %v715_v37 }
 0x143   : > { %770 = vmatpush1.msra.mxu1 %v714_v34 }
 0x144   : > { %771 = vmatprep.subr.mxu1 %v713_v31 }
 0x145   : > { %772 = vmatpush1.msra.mxu1 %v712_v46 }
 0x146   : > { %953 = vmatmul.mubr.msk.f32.vlgmr.msra.gmra.mxu1 %vm734_vm1, %v720_v29 }
 0x147   : > { %811 = vmatprep.mubr.f32.mxu1 %v1166_v3 }
 0x14a   : > { %954 = vmatmul.mubr.msk.f32.gmra.mxu1 %vm734_vm1, %v721_v23 }
 0x206   : > { %v807_v48 = vpop.f32.mrf.mxu1 }
 0x207   : > { %v808_v49 = vadd.f32 %v807_v48, %v727_v26 }
 0x208   : > { %v809_v50 = vpop.f32.mrf.mxu1 }
 0x209   : > { %818 = vst [vmem:[%s230_s6] sm:$0xff] %v808_v49  ;;  %v810_v51 = vadd.f32 %v809_v50, %v727_v26 }
 0x20a   : > { %v813_v53 = vpop.f32.mrf.mxu1 }
 0x20b   : > { %819 = vst [vmem:[%s230_s6 + $0x8] sm:$0xff] %v810_v51  ;;  %v814_v3 = vadd.f32 %v813_v53, %v732_v52 }
 0x20c   : > { %v815_v54 = vpop.f32.mrf.mxu1 }
 0x20d   : > { %820 = vst [vmem:[%s230_s6 + $0x10] sm:$0x1] %v814_v3  ;;  %v816_v55 = vadd.f32 %v815_v54, %v732_v52 }
 0x20f   : > { %821 = vst [vmem:[%s230_s6 + $0x18] sm:$0x1] %v816_v55 }
 0x210   : > { %1116 = shalt.err (!%p1113_p3)
}
 0x211   : > { %s1117_s15 = scalar_lea.hbm %s1523_s10, 512  ;;  %s1121_s25 = scalar_lea.hbm %s1570_s5, 1024 }
 0x212   : > { %p1118_p4 = scmp.ne.s32.totalorder %s1523_s10, %s1117_s15  ;;  %p1122_p9 = scmp.lt.s32.totalorder %s1523_s10, %s1570_s5 }
 0x213   : > { %p1123_p10 = scmp.lt.s32.totalorder %s1121_s25, %s1117_s15 }
 0x214   : > { %p1119_p7 = pnand %p1118_p4, %p1239_p5 }
 0x215   : > { %p1124_p11 = por %p1123_p10, %p1122_p9 }
 0x216   : > { %p1120_p8 = pneg %p1119_p7 }
 0x218   : > { %p1125_p12 = pnand %p1124_p11, %p1120_p8 }
 0x21a   : > { %1128 = shalt.err (!%p1125_p12)
}
 0x21b   : > { %s1168_s6 = smov 256   ;;  %s1169_s17 = smov 512  }
 0x21c   : > { %s1170_s8 = smov 16  }
 0x21d   : > { %1057 = dma.vmem_to_hbm [thread:$0]  (%p1239_p5), %s1518_s7, 512, %s1523_s10, %s1525_s11, %s1168_s6, %s1169_s17, %s1170_s8  }
 0x21e PF: > { %p1063_p13 = scmp.ge.s32.totalorder %s1163_s21, 2  ;;  %s851_s9 = sand.u32 1, %s1151_s18  }
 0x21f   : > { %s852_s22 = scalar_lea.sflag [#allocation3], %s851_s9 }
 0x220   : > { %p1060_p0 = pnand %p1063_p13, %p1243_p6 }
 0x222   : > { %p1061_p1 = pneg %p1060_p0 }
 0x224   : > { %1146 = dma.done.wait (%p1061_p1), %s852_s22, 512  }
 0x225   : > { %1148 = vsyncadd (%p1061_p1), %s852_s22, 4294966784  ;;  %p15_p2 = scmp.ge.s32.totalorder %s1226_s24, 4   ;;  %s1573_s18 = smov %s1155_s19 }
 0x226   : > { %s1574_s19 = smov %s1159_s20  ;;  %s1575_s20 = smov %s1237_s27 }
 0x227   : > { %s1576_s21 = smov %s1226_s24  ;;  %17 = sbr.rel (!%p15_p2) target bundleno = 3 (0x3), region = 75 }
 0x22c   :  { %857 = vsyncpa [#allocation3], 1 }
 0x22d   :  { %859 = vsyncpa [#allocation3 + $0x1], 1 }

</bundles_post_ra>
